<compile_context>
chip_gen: v7x
topology: tpu7x:2x2x1
jax: 0.10.0
libtpu: 0.0.40
codegen_flags: <defaults>
</compile_context>

<pallas_src>
import functools
import math

import jax
import jax.numpy as jnp
from jax.experimental import pallas as pl
from jax.experimental.pallas import tpu as pltpu


def _popart_affine_kernel(x_ref, a_ref, c_ref, out_ref):
    # x_ref/out_ref: (block_rows, LANES); a_ref/c_ref: (1, LANES) broadcast rows.
    x = x_ref[...].astype(jnp.float32)
    out_ref[...] = (a_ref[...] * x + c_ref[...]).astype(out_ref.dtype)


def _fold_affine(w, b, mu, nu, normalized):
    """Fold PopArt buffers into (scale, shift) vectors of shape (G, 1), f32."""
    wf = w.astype(jnp.float32)
    bf = b.astype(jnp.float32)
    if normalized:
        return wf, bf
    muf = mu.astype(jnp.float32)
    nuf = nu.astype(jnp.float32)
    inner = jnp.clip(nuf - muf * muf, 1e-4, 1e8)
    sigma = jnp.clip(jnp.sqrt(inner), 1e-4, 1e6)
    #   sigma*(w*x + b) + mu == (sigma*w)*x + (sigma*b + mu)
    return sigma * wf, sigma * bf + muf


def popart_forward(x, w, b, mu, nu, *, normalized=True, enabled=True,
                   min_pallas_elems=65536, target_block_bytes=2 * 1024 * 1024):
    """PopArt forward.

    Args:
      x: value estimates, shape (..., G, 1), any float dtype.
      w, b, mu, nu: PopArt buffers, shape (G, 1).
      normalized: True -> w*x+b ; False -> sigma*(w*x+b)+mu.
      enabled: if False, identity (no-op), matching the PyTorch module.
      min_pallas_elems: below this element count, use pure JAX (XLA fuses it).
      target_block_bytes: approximate per-block f32 footprint for the kernel.
    """
    if not enabled:
        return x

    orig_shape = x.shape
    orig_dtype = x.dtype
    G = w.shape[0]
    assert orig_shape[-2] == G and orig_shape[-1] == 1, (
        f"expected x of shape (..., {G}, 1), got {orig_shape}")

    a_vec, c_vec = _fold_affine(w, b, mu, nu, normalized)   # (G, 1) f32

    N = x.size
    if N < min_pallas_elems:
        # Launch + pipeline overhead would dominate; let XLA fuse the affine.
        y = a_vec * x.astype(jnp.float32) + c_vec
        return y.astype(orig_dtype)

    # ---- Lane-dense flat layout ---------------------------------------------
    # LANES: multiple of 128 (full vector lanes) and of G (so gamma = col % G).
    lcm = G * 128 // math.gcd(G, 128)
    lanes = lcm * max(1, 512 // lcm)

    x_flat = x.reshape(-1)
    pad = (-N) % lanes
    if pad:
        x_flat = jnp.pad(x_flat, (0, pad))        # at most lanes-1 extra elems
    rows = x_flat.size // lanes
    x2 = x_flat.reshape(rows, lanes)

    a_row = jnp.tile(a_vec.reshape(1, G), (1, lanes // G))   # (1, LANES) f32
    c_row = jnp.tile(c_vec.reshape(1, G), (1, lanes // G))   # (1, LANES) f32

    # ---- Block sizing --------------------------------------------------------
    target_rows = max(8, (target_block_bytes // (4 * lanes)) // 8 * 8)
    if rows < 8:
        block_rows = rows                         # block == full row extent
    else:
        # Keep blocks big, but prefer >= 2 grid steps so v7x megacore shards.
        block_rows = min(target_rows, max(8, (rows // 2) // 8 * 8))
    grid = (pl.cdiv(rows, block_rows),)           # ragged last block is masked

    out2 = pl.pallas_call(
        _popart_affine_kernel,
        out_shape=jax.ShapeDtypeStruct((rows, lanes), orig_dtype),
        grid_spec=pltpu.PrefetchScalarGridSpec(
            num_scalar_prefetch=0,
            grid=grid,
            in_specs=[
                pl.BlockSpec((block_rows, lanes), lambda i: (i, 0)),   # x tile
                pl.BlockSpec((1, lanes), lambda i: (0, 0)),            # scale
                pl.BlockSpec((1, lanes), lambda i: (0, 0)),            # shift
            ],
            out_specs=pl.BlockSpec((block_rows, lanes), lambda i: (i, 0)),
        ),
        compiler_params=pltpu.CompilerParams(
            dimension_semantics=("parallel",)),
    )(x2, a_row, c_row)

    out_flat = out2.reshape(-1)
    if pad:
        out_flat = out_flat[:N]
    return out_flat.reshape(orig_shape)


def _reference(x, w, b, mu, nu, normalized):
    # Pure-JAX reference mirroring the PyTorch forward exactly.
    xf = x.astype(jnp.float32)
    y = w * xf + b
    if not normalized:
        inner = jnp.clip(nu - mu ** 2, 1e-4, 1e8)
        sigma = jnp.clip(jnp.sqrt(inner), 1e-4, 1e6)
        y = sigma * y + mu
    return y.astype(x.dtype)


if __name__ == "__main__":
    key = jax.random.PRNGKey(0)

    # Module __init__: mu=zeros(G,1), nu=100*ones(G,1), w=ones(G,1), b=zeros(G,1)
    G = 4
    init_nu = 100.0
    mu = jnp.zeros((G, 1), jnp.float32)
    nu = jnp.ones((G, 1), jnp.float32) * init_nu
    w = jnp.ones((G, 1), jnp.float32)
    b = jnp.zeros((G, 1), jnp.float32)

    # Simulate a few update_stats steps so w/b/mu/nu are non-trivial.
    # TODO(synk): update_stats is tiny per-gamma scalar glue; kept in pure JAX.
    beta = 5e-4
    k1, k2, k3 = jax.random.split(key, 3)
    for t in range(2, 5):
        sample = jax.random.normal(jax.random.fold_in(k1, t), (64, G)) * 3.0 + 1.5
        inner = jnp.clip(nu - mu ** 2, 1e-4, 1e8)
        old_sigma = jnp.clip(jnp.sqrt(inner), 1e-4, 1e6)
        old_mu = mu
        beta_t = beta / (1.0 - (1.0 - beta) ** t)
        mean = sample.mean(0).reshape(G, 1)
        sq_mean = (sample ** 2).mean(0).reshape(G, 1)
        mu = (1.0 - beta_t) * mu + beta_t * mean
        nu = (1.0 - beta_t) * nu + beta_t * sq_mean
        inner = jnp.clip(nu - mu ** 2, 1e-4, 1e8)
        sigma = jnp.clip(jnp.sqrt(inner), 1e-4, 1e6)
        w = w * (old_sigma / sigma)
        b = (old_sigma * b + old_mu - mu) / sigma

    # 1) Module-natural small shape (Batch, Length, gammas, 1); force Pallas path.
    B, L = 2, 8
    x_small = jax.random.normal(k2, (B, L, G, 1), jnp.float32)
    out_n = popart_forward(x_small, w, b, mu, nu, normalized=True,
                           min_pallas_elems=0)
    out_d = popart_forward(x_small, w, b, mu, nu, normalized=False,
                           min_pallas_elems=0)

    # 2) Moderate shape exercising the multi-block + ragged-row-block path.
    B2, L2 = 3, 700
    x_big = jax.random.normal(k3, (B2, L2, G, 1), jnp.float32)
    out_nb = popart_forward(x_big, w, b, mu, nu, normalized=True,
                            min_pallas_elems=0)
    out_db = popart_forward(x_big, w, b, mu, nu, normalized=False,
                            min_pallas_elems=0)

    # 3) Default small-input bypass (pure JAX) for semantic equivalence.
    out_bypass = popart_forward(x_small, w, b, mu, nu, normalized=False)

    jax.block_until_ready((out_n, out_d, out_nb, out_db, out_bypass))

    checks = [
        (out_n, x_small, True), (out_d, x_small, False),
        (out_nb, x_big, True), (out_db, x_big, False),
        (out_bypass, x_small, False),
    ]
    for got, xin, norm in checks:
        ref = _reference(xin, w, b, mu, nu, norm)
        assert got.shape == xin.shape and got.dtype == xin.dtype
        assert jnp.allclose(got, ref, atol=1e-4, rtol=1e-5), (
            float(jnp.abs(got.astype(jnp.float32) - ref.astype(jnp.float32)).max()))

    print("KERNEL_OK")
</pallas_src>

<mosaic_0001>
module attributes {stable_mosaic.version = 11 : i64} {
  func.func @_popart_affine_kernel(%arg0: i32, %arg1: memref<1x512xf32, #tpu.memory_space<vmem>>, %arg2: memref<1x512xf32, #tpu.memory_space<vmem>>, %arg3: memref<1x512xf32, #tpu.memory_space<vmem>>, %arg4: memref<1x512xf32, #tpu.memory_space<vmem>>) attributes {dimension_semantics = [#tpu.dimension_semantics<parallel>], iteration_bounds = array<i64: 1>, scalar_prefetch = 0 : i64, scratch_operands = 0 : i64, tpu.core_type = #tpu.core_type<tc>, window_params = [{transform_indices = @transform_0, window_bounds = array<i64: 1, 512>}, {pipeline_mode = #tpu.pipeline_mode<synchronous>, transform_indices = @transform_1, window_bounds = array<i64: 1, 512>}, {pipeline_mode = #tpu.pipeline_mode<synchronous>, transform_indices = @transform_2, window_bounds = array<i64: 1, 512>}, {transform_indices = @transform_3, window_bounds = array<i64: 1, 512>}]} {
    %c0 = arith.constant 0 : index
    %c0_0 = arith.constant 0 : index
    %0 = vector.load %arg1[%c0, %c0_0] : memref<1x512xf32, #tpu.memory_space<vmem>>, vector<1x512xf32>
    %c0_1 = arith.constant 0 : index
    %c0_2 = arith.constant 0 : index
    %1 = vector.load %arg2[%c0_1, %c0_2] : memref<1x512xf32, #tpu.memory_space<vmem>>, vector<1x512xf32>
    %2 = arith.mulf %1, %0 : vector<1x512xf32>
    %c0_3 = arith.constant 0 : index
    %c0_4 = arith.constant 0 : index
    %3 = vector.load %arg3[%c0_3, %c0_4] : memref<1x512xf32, #tpu.memory_space<vmem>>, vector<1x512xf32>
    %4 = arith.addf %2, %3 : vector<1x512xf32>
    %c0_5 = arith.constant 0 : index
    %c0_6 = arith.constant 0 : index
    %5 = vector.load %arg4[%c0_5, %c0_6] : memref<1x512xf32, #tpu.memory_space<vmem>>, vector<1x512xf32>
    tpu.vector_store %arg4[%c0_5, %c0_6], %4 {strides = array<i32>} : memref<1x512xf32, #tpu.memory_space<vmem>>, vector<1x512xf32>,
    return
  }
  func.func @transform_0(%arg0: i32) -> (i32, i32) {
    %c0_i32 = arith.constant 0 : i32
    %c0_i32_0 = arith.constant 0 : i32
    return %arg0, %c0_i32 : i32, i32
  }
  func.func @transform_1(%arg0: i32) -> (i32, i32) {
    %c0_i32 = arith.constant 0 : i32
    %c0_i32_0 = arith.constant 0 : i32
    %c0_i32_1 = arith.constant 0 : i32
    return %c0_i32, %c0_i32_0 : i32, i32
  }
  func.func @transform_2(%arg0: i32) -> (i32, i32) {
    %c0_i32 = arith.constant 0 : i32
    %c0_i32_0 = arith.constant 0 : i32
    %c0_i32_1 = arith.constant 0 : i32
    return %c0_i32, %c0_i32_0 : i32, i32
  }
  func.func @transform_3(%arg0: i32) -> (i32, i32) {
    %c0_i32 = arith.constant 0 : i32
    %c0_i32_0 = arith.constant 0 : i32
    return %arg0, %c0_i32 : i32, i32
  }
}

</mosaic_0001>

<bundles_post_ra>
// kernel: tpu_custom_call.1
= control target key start
LH: loop header
LB: loop body
LE: loop exit
PB: predicated region body
PF: predicated region fallthrough
CT: control target
= control target key end

     0   :  { %8 = vsyncpa [#allocation3], 0  ;;  %s202_s0 = inlined_call_operand.hbm [shape: f32[1,512], index: 0, kind: input, shape index: {}]   ;;  %s203_s1 = inlined_call_operand.hbm [shape: f32[1,512], index: 1, kind: input, shape index: {}]   ;;  %s204_s2 = inlined_call_operand.vmem [shape: f32[1,512], index: 2, kind: input, shape index: {}]   ;;  %s205_s3 = inlined_call_operand.hbm [shape: f32[1,512], index: 3, kind: output, shape index: {}]  }
   0x1   :  { %9 = vsyncpa [#allocation6], 0 }
   0x2   :  { %10 = vsyncpa [#allocation4], 0  ;;  %s140_s12 = smov [#allocation2]   ;;  %s141_s14 = smov [#allocation5]  }
   0x3   :  { %s17_s13 = sshll.u32 %s140_s12, 4  ;;  %s27_s15 = sshll.u32 %s141_s14, 4  ;;  %s18_s13 = int_to_ptr.vmem [resolvable:$true] %s17_s13  ;;  %s28_s15 = int_to_ptr.vmem [resolvable:$true] %s27_s15 }
   0x4   :  { %s68_s18 = scalar_lea.hbm %s202_s0, 64 }
   0x5   :  { %p69_p0 = scmp.ne.s32.totalorder %s202_s0, %s68_s18  ;;  %p72_p1 = scmp.lt.u32.totalorder %s68_s18, %s202_s0 }
   0x7   :  { %p74_p2 = pnand %p72_p1, %p69_p0 }
   0x9   :  { %77 = shalt.err (!%p74_p2)
}
   0xa   :  { %s78_s23 = scalar_lea.vmem %s18_s13, 64  ;;  %p83_p4 = scmp.lt.s32.totalorder %s18_s13, %s18_s13 }
   0xb   :  { %p79_p3 = scmp.ne.s32.totalorder %s18_s13, %s78_s23  ;;  %p84_p5 = scmp.lt.s32.totalorder %s78_s23, %s78_s23 }
   0xd   :  { %p85_p6 = por %p84_p5, %p83_p4 }
   0xf   :  { %p86_p7 = pnand %p85_p6, %p79_p3 }
  0x11   :  { %89 = shalt.err (!%p86_p7)
}
  0x12   :  { %20 = dma.hbm_to_vmem [thread:$0]  %s202_s0, 64, %s18_s13, [#allocation3]  }
  0x13   :  { %s90_s28 = scalar_lea.hbm %s203_s1, 64 }
  0x14   :  { %p91_p8 = scmp.ne.s32.totalorder %s203_s1, %s90_s28  ;;  %p94_p9 = scmp.lt.u32.totalorder %s90_s28, %s203_s1 }
  0x16   :  { %p96_p10 = pnand %p94_p9, %p91_p8 }
  0x18   :  { %99 = shalt.err (!%p96_p10)
}
  0x19   :  { %s100_s6 = scalar_lea.vmem %s28_s15, 64  ;;  %p105_p12 = scmp.lt.s32.totalorder %s28_s15, %s28_s15 }
  0x1a   :  { %p101_p11 = scmp.ne.s32.totalorder %s28_s15, %s100_s6  ;;  %p106_p13 = scmp.lt.s32.totalorder %s100_s6, %s100_s6 }
  0x1c   :  { %p107_p0 = por %p106_p13, %p105_p12 }
  0x1e   :  { %p108_p1 = pnand %p107_p0, %p101_p11 }
  0x20   :  { %111 = shalt.err (!%p108_p1)
}
  0x21   :  { %30 = dma.hbm_to_vmem [thread:$0]  %s203_s1, 64, %s28_s15, [#allocation6]  }
  0x22   :  { %134 = dma.done.wait [#allocation3], 64  }
  0x23   :  { %135 = vsyncadd [#allocation3], 4294967232 }
  0x24   :  { %136 = dma.done.wait [#allocation6], 64  }
  0x25   :  { %137 = vsyncadd [#allocation6], 4294967232  ;;  %v44_v0 = vlaneseq  ;;  %s142_s8 = smov [#allocation7]   ;;  %v39_v1 = vld [vmem:[#allocation2] sm:$0xf] }
  0x26   :  { %s55_s9 = sshll.u32 %s142_s8, 4  ;;  %v40_v2 = vld [vmem:[#allocation5] sm:$0xf]  ;;  %v42_v3 = vld [vmem:[%s204_s2] sm:$0xf]  ;;  %s56_s9 = int_to_ptr.vmem [resolvable:$true] %s55_s9 }
  0x27   :  { %v41_v4 = vmul.f32 %v40_v2, %v39_v1  ;;  %vm46_vm0 = vcmp.lt.s32.totalorder %v44_v0, 512  ;;  %s112_s12 = scalar_lea.vmem %s56_s9, 64  ;;  %p117_p3 = scmp.lt.s32.totalorder %s56_s9, %s56_s9 }
  0x28   :  { %p113_p2 = scmp.ne.s32.totalorder %s56_s9, %s112_s12  ;;  %p118_p4 = scmp.lt.s32.totalorder %s112_s12, %s112_s12 }
  0x29   :  { %v43_v5 = vadd.f32 %v42_v3, %v41_v4 }
  0x2a   :  { %p119_p5 = por %p118_p4, %p117_p3 }
  0x2b   :  { %48 = vst.msk [vmem:[#allocation7] sm:$0xf] %vm46_vm0, %v43_v5 }
  0x2c   :  { %p120_p6 = pnand %p119_p5, %p113_p2 }
  0x2e   :  { %123 = shalt.err (!%p120_p6)
}
  0x2f   :  { %s124_s14 = scalar_lea.hbm %s205_s3, 64 }
  0x30   :  { %p125_p7 = scmp.ne.s32.totalorder %s205_s3, %s124_s14  ;;  %p128_p8 = scmp.lt.u32.totalorder %s124_s14, %s205_s3 }
  0x32   :  { %p130_p9 = pnand %p128_p8, %p125_p7 }
  0x34   :  { %133 = shalt.err (!%p130_p9)
}
  0x35   :  { %58 = dma.vmem_to_hbm [thread:$0]  %s56_s9, 64, %s205_s3, [#allocation4]  }
  0x36   :  { %138 = dma.done.wait [#allocation4], 64  }
  0x37   :  { %139 = vsyncadd [#allocation4], 4294967232 }
  0x38   :  { %62 = vsyncpa [#allocation3], 1 }
  0x39   :  { %63 = vsyncpa [#allocation6], 1 }
  0x3a   :  { %64 = vsyncpa [#allocation4], 1 }

</bundles_post_ra>
